<compile_context>
chip_gen: v7x
topology: tpu7x:2x2x1
jax: 0.10.0
libtpu: 0.0.40
codegen_flags: <defaults>
</compile_context>

<pallas_src>
import functools

import jax
import jax.numpy as jnp
from jax.experimental import pallas as pl
from jax.experimental.pallas import tpu as pltpu


# ----------------------------------------------------------------------------- kernel


def _patch_merging_kernel(x_ref, w_top_ref, w_bot_ref, bias_ref, o_ref, *, eps):
    """Fused 2x2-merge + LayerNorm(4C) + Linear(4C -> 2C, no bias).

    x_ref:     (TH, 2, W2, 2C)   slab of the freely-reshaped NHWC input
    w_top_ref: (2C, 2C_out)      gamma-folded weight rows for the r0-half
    w_bot_ref: (2C, 2C_out)      gamma-folded weight rows for the r1-half
    bias_ref:  (1, 2C_out) f32   beta @ W^T (LayerNorm bias folded through Linear)
    o_ref:     (TH*W2, 2C_out)   flat, lane-dense output slab
    """
    th, _, w2, two_c = x_ref.shape
    rows = th * w2
    inv_4c = 1.0 / (2 * two_c)

    x = x_ref[...]
    # Sub-row 0 carries [r0c0 | r0c1] channels, sub-row 1 carries [r1c0 | r1c1];
    # together they are the torch view->permute->view 4C row.  Cast to f32 before
    # the flatten so the (TH, W2, 2C)->(rows, 2C) reshape is a pure vreg relabel
    # whenever W2 % 8 == 0 (true for the demo; see TODO in the wrapper otherwise).
    r0 = x[:, 0, :, :].astype(jnp.float32).reshape(rows, two_c)
    r1 = x[:, 1, :, :].astype(jnp.float32).reshape(rows, two_c)

    # One-pass LayerNorm statistics over the virtual 4C row (r0 ++ r1).
    s = jnp.sum(r0, axis=-1, keepdims=True) + jnp.sum(r1, axis=-1, keepdims=True)
    ss = (jnp.sum(r0 * r0, axis=-1, keepdims=True)
          + jnp.sum(r1 * r1, axis=-1, keepdims=True))
    mean = s * inv_4c
    var = ss * inv_4c - mean * mean
    inv = jax.lax.rsqrt(var + eps)

    # gamma is folded into w_top/w_bot and beta into bias, so normalization is the
    # only remaining full-width VPU work before the MXU.
    n0 = ((r0 - mean) * inv).astype(w_top_ref.dtype)
    n1 = ((r1 - mean) * inv).astype(w_bot_ref.dtype)

    y = jnp.dot(n0, w_top_ref[...], preferred_element_type=jnp.float32)
    y = y + jnp.dot(n1, w_bot_ref[...], preferred_element_type=jnp.float32)
    o_ref[...] = (y + bias_ref[...]).astype(o_ref.dtype)


# --------------------------------------------------------------------- parameter prep


def prepare_patch_merging_params(gamma, beta, weight, *, matmul_dtype=jnp.bfloat16):
    """One-time parameter prep (hoisted out of the hot path).

    gamma, beta: (4C,) LayerNorm affine params.
    weight:      (2C_out, 4C) torch nn.Linear weight layout (out, in), no bias.

    The 4C ordering is the spec module's view->permute->view order
    (r0c0, r0c1, r1c0, r1c1).  If loading a checkpoint that instead used
    torch.cat([x0, x1, x2, x3]) (torchvision Swin order r0c0, r1c0, r0c1, r1c1),
    permute gamma/beta and weight's input columns here first (one-time, free).

    Returns (w_top (2C,2C_out), w_bot (2C,2C_out), bias (1,2C_out) f32), where the
    LayerNorm affine is already folded in:  y = xn @ (gamma*W^T) + beta @ W^T.
    """
    four_c = gamma.shape[-1]
    two_c = four_c // 2
    g = jnp.asarray(gamma, jnp.float32)
    b = jnp.asarray(beta, jnp.float32)
    w_t = jnp.asarray(weight, jnp.float32).T          # (4C, 2C_out)
    w_eff = (g[:, None] * w_t).astype(matmul_dtype)   # gamma folded into weights
    bias = (b @ w_t).reshape(1, -1)                   # beta folded through Linear (f32)
    return w_eff[:two_c], w_eff[two_c:], bias


# ----------------------------------------------------------------------------- helpers


def _pad_lanes(n):
    return ((n + 127) // 128) * 128


def _vmem_capacity_bytes():
    try:
        cap = getattr(pltpu.get_tpu_info(), "vmem_capacity_bytes", None)
        if cap:
            return int(cap)
    except Exception:
        pass
    return 64 << 20  # conservative default (v7x per-core VMEM)


def _pick_th(bh2, w2, cap, row_align):
    """Largest divisor of bh2 <= cap with (th*w2) % row_align == 0 (legal out block)."""
    divs = [d for d in range(1, bh2 + 1) if bh2 % d == 0]
    aligned = [d for d in divs if (d * w2) % row_align == 0]
    under = [d for d in aligned if d <= cap]
    if under:
        return max(under)
    if aligned:
        return min(aligned)  # smallest legal tile (may exceed cap for odd shapes)
    return bh2               # block == full array: always legal, single grid step


# ----------------------------------------------------------------------------- wrapper


def patch_merging(x, w_top, w_bot, bias, *, eps=1e-5, target_rows=4096):
    """Forward pass of PatchMerging.  x: (B, H, W, C) -> (B, H//2, W//2, 2C_out)."""
    B, H, W, C = x.shape
    assert H % 2 == 0 and W % 2 == 0, "PatchMerging needs even H and W"
    two_c_in = 2 * C
    two_c_out = w_top.shape[-1]
    assert w_top.shape == (two_c_in, two_c_out)
    assert w_bot.shape == (two_c_in, two_c_out)
    assert bias.shape == (1, two_c_out)

    bh2 = B * (H // 2)
    w2 = W // 2

    in_isz = jnp.dtype(x.dtype).itemsize
    row_align = 8 * max(1, 4 // in_isz)            # sublane packing of in/out dtype
    lanes_in = _pad_lanes(two_c_in)
    lanes_out = _pad_lanes(two_c_out)

    # --- tile selection -------------------------------------------------------
    # VMEM bytes per super-row (= w2 merged rows): 2x double-buffered input block,
    # 2x output block, plus the in-kernel f32 intermediates (r0/r1, squares,
    # normalized halves + casts, f32 accumulator) -- counted, per review.
    per_row = (2 * 2 * w2 * lanes_in * in_isz
               + 2 * w2 * lanes_out * in_isz
               + 8 * w2 * lanes_in * 4
               + 2 * w2 * lanes_out * 4)
    vmem_cap = _vmem_capacity_bytes()              # 128 MiB v5e/v6e, 64 MiB v7x
    th_vmem = max(1, int(vmem_cap * 0.55) // max(per_row, 1))
    th_tgt = max(1, target_rows // max(w2, 1))
    min_steps = min(8, bh2)                        # >=2 pipelined steps per TC (v7x has 2)
    cap = max(1, min(th_vmem, th_tgt, bh2 // min_steps))
    th = _pick_th(bh2, w2, cap, row_align)
    rows = th * w2

    # --- explicit scoped-VMEM budget (includes intermediates) ------------------
    in_block = th * 2 * w2 * lanes_in * in_isz
    out_block = rows * lanes_out * in_isz
    interm = 8 * rows * lanes_in * 4 + 2 * rows * lanes_out * 4
    const_bytes = ((w_top.size + w_bot.size) * jnp.dtype(w_top.dtype).itemsize
                   + bias.size * 4)
    vmem_limit = 2 * in_block + 2 * out_block + interm + const_bytes + (4 << 20)
    vmem_limit = int(min(max(vmem_limit, 16 << 20), int(vmem_cap * 0.75)))

    # Free reshape (pure regrouping of the contiguous NHWC tensor): no transpose,
    # no extra HBM round trip for the 2x2 merge.
    x5 = x.reshape(bh2, 2, w2, two_c_in)

    kernel = functools.partial(_patch_merging_kernel, eps=eps)

    out2d = pl.pallas_call(
        kernel,
        # Flat lane-dense 2-D output slab; (B, H/2, W/2, 2C) reshape below is free.
        out_shape=jax.ShapeDtypeStruct((bh2 * w2, two_c_out), x.dtype),
        grid_spec=pltpu.PrefetchScalarGridSpec(
            num_scalar_prefetch=0,
            grid=(bh2 // th,),
            in_specs=[
                pl.BlockSpec((th, 2, w2, two_c_in), lambda i: (i, 0, 0, 0)),
                # Grid-invariant operands: whole-array VMEM residents (no revolving
                # double buffers).
                pl.BlockSpec(memory_space=pltpu.MemorySpace.VMEM),
                pl.BlockSpec(memory_space=pltpu.MemorySpace.VMEM),
                pl.BlockSpec(memory_space=pltpu.MemorySpace.VMEM),
            ],
            out_specs=pl.BlockSpec((rows, two_c_out), lambda i: (i, 0)),
        ),
        compiler_params=pltpu.CompilerParams(
            dimension_semantics=("parallel",),
            vmem_limit_bytes=vmem_limit,
        ),
    )(x5, w_top, w_bot, bias)

    # TODO(synk): for tiny channel counts (2C < 128, e.g. this toy config) the store
    # is still lane-sparse and the in-kernel flatten needs W/2 % 8 (f32) / % 16 (bf16)
    # to stay a vreg relabel; fold W/2 into the lane dim if small-C perf matters.
    return out2d.reshape(B, H // 2, W // 2, two_c_out)


# --------------------------------------------------------------------------- reference


def patch_merging_ref(x, gamma, beta, weight, *, eps=1e-5):
    """Pure-JAX reference mirroring the PyTorch forward (f32 math)."""
    B, H, W, C = x.shape
    x6 = x.reshape(B, H // 2, 2, W // 2, 2, C).astype(jnp.float32)
    x6 = jnp.transpose(x6, (0, 1, 3, 2, 4, 5))
    xm = x6.reshape(B, H // 2, W // 2, 4 * C)
    mean = jnp.mean(xm, axis=-1, keepdims=True)
    var = jnp.mean((xm - mean) ** 2, axis=-1, keepdims=True)
    xn = (xm - mean) / jnp.sqrt(var + eps)
    xn = xn * gamma.astype(jnp.float32) + beta.astype(jnp.float32)
    y = xn @ weight.astype(jnp.float32).T
    return y.astype(x.dtype)


if __name__ == "__main__":
    # dim (C) = 4, B = 2, H = W = 16  ->  x: (2, 16, 16, 4)
    B, H, W, C = 2, 16, 16, 4
    key = jax.random.PRNGKey(0)
    kx, kg, kb, kw = jax.random.split(key, 4)

    x = jax.random.normal(kx, (B, H, W, C), dtype=jnp.float32)

    # Module parameters: LayerNorm(4*dim) affine + Linear(4*dim, 2*dim, bias=False).
    gamma = 1.0 + 0.01 * jax.random.normal(kg, (4 * C,), dtype=jnp.float32)
    beta = 0.01 * jax.random.normal(kb, (4 * C,), dtype=jnp.float32)
    w_reduction = jax.random.normal(kw, (2 * C, 4 * C), dtype=jnp.float32) * 0.1

    ref = patch_merging_ref(x, gamma, beta, w_reduction)
    fwd = jax.jit(patch_merging)

    # Exact-math check: f32 matmul path matches the f32 reference tightly.
    params_f32 = prepare_patch_merging_params(gamma, beta, w_reduction,
                                              matmul_dtype=jnp.float32)
    out_f32 = jax.block_until_ready(fwd(x, *params_f32))
    assert out_f32.shape == (B, H // 2, W // 2, 2 * C), out_f32.shape
    assert jnp.allclose(out_f32, ref, atol=1e-4, rtol=1e-4), "f32 path mismatch"

    # Default fast path: bf16 MXU inputs (LN stays f32) -> looser tolerance.
    params_bf16 = prepare_patch_merging_params(gamma, beta, w_reduction)
    out_bf16 = jax.block_until_ready(fwd(x, *params_bf16))
    assert out_bf16.shape == (B, H // 2, W // 2, 2 * C), out_bf16.shape
    assert jnp.allclose(out_bf16, ref, atol=3e-2, rtol=3e-2), "bf16 path mismatch"

    print("KERNEL_OK")
</pallas_src>

<mosaic_0001>
module attributes {stable_mosaic.version = 11 : i64} {
  func.func @_patch_merging_kernel(%arg0: i32, %arg1: memref<2x2x8x8xf32, #tpu.memory_space<vmem>>, %arg2: memref<8x8xf32, #tpu.memory_space<vmem>>, %arg3: memref<8x8xf32, #tpu.memory_space<vmem>>, %arg4: memref<1x8xf32, #tpu.memory_space<vmem>>, %arg5: memref<16x8xf32, #tpu.memory_space<vmem>>) attributes {dimension_semantics = [#tpu.dimension_semantics<parallel>], iteration_bounds = array<i64: 8>, scalar_prefetch = 0 : i64, scratch_operands = 0 : i64, tpu.core_type = #tpu.core_type<tc>, window_params = [{transform_indices = @transform_0, window_bounds = array<i64: 2, 2, 8, 8>}, {pipeline_mode = #tpu.pipeline_mode<synchronous>, transform_indices = @transform_1, window_bounds = array<i64: 8, 8>}, {pipeline_mode = #tpu.pipeline_mode<synchronous>, transform_indices = @transform_2, window_bounds = array<i64: 8, 8>}, {pipeline_mode = #tpu.pipeline_mode<synchronous>, transform_indices = @transform_3, window_bounds = array<i64: 1, 8>}, {transform_indices = @transform_4, window_bounds = array<i64: 16, 8>}]} {
    %c0 = arith.constant 0 : index
    %c0_0 = arith.constant 0 : index
    %c0_1 = arith.constant 0 : index
    %c0_2 = arith.constant 0 : index
    %0 = vector.load %arg1[%c0, %c0_0, %c0_1, %c0_2] : memref<2x2x8x8xf32, #tpu.memory_space<vmem>>, vector<2x2x8x8xf32>
    %1 = vector.extract_strided_slice %0 {offsets = [0, 0, 0, 0], sizes = [2, 1, 8, 8], strides = [1, 1, 1, 1]} : vector<2x2x8x8xf32> to vector<2x1x8x8xf32>
    %2 = vector.shape_cast %1 : vector<2x1x8x8xf32> to vector<2x8x8xf32>
    %3 = vector.shape_cast %2 : vector<2x8x8xf32> to vector<16x8xf32>
    %4 = vector.extract_strided_slice %0 {offsets = [0, 1, 0, 0], sizes = [2, 1, 8, 8], strides = [1, 1, 1, 1]} : vector<2x2x8x8xf32> to vector<2x1x8x8xf32>
    %5 = vector.shape_cast %4 : vector<2x1x8x8xf32> to vector<2x8x8xf32>
    %6 = vector.shape_cast %5 : vector<2x8x8xf32> to vector<16x8xf32>
    %cst = arith.constant dense<0.000000e+00> : vector<16xf32>
    %7 = vector.multi_reduction <add>, %3, %cst [1] : vector<16x8xf32> to vector<16xf32>
    %8 = vector.shape_cast %7 : vector<16xf32> to vector<16x1xf32>
    %cst_3 = arith.constant dense<0.000000e+00> : vector<16xf32>
    %9 = vector.multi_reduction <add>, %6, %cst_3 [1] : vector<16x8xf32> to vector<16xf32>
    %10 = vector.shape_cast %9 : vector<16xf32> to vector<16x1xf32>
    %11 = arith.addf %8, %10 : vector<16x1xf32>
    %12 = arith.mulf %3, %3 : vector<16x8xf32>
    %cst_4 = arith.constant dense<0.000000e+00> : vector<16xf32>
    %13 = vector.multi_reduction <add>, %12, %cst_4 [1] : vector<16x8xf32> to vector<16xf32>
    %14 = vector.shape_cast %13 : vector<16xf32> to vector<16x1xf32>
    %15 = arith.mulf %6, %6 : vector<16x8xf32>
    %cst_5 = arith.constant dense<0.000000e+00> : vector<16xf32>
    %16 = vector.multi_reduction <add>, %15, %cst_5 [1] : vector<16x8xf32> to vector<16xf32>
    %17 = vector.shape_cast %16 : vector<16xf32> to vector<16x1xf32>
    %18 = arith.addf %14, %17 : vector<16x1xf32>
    %cst_6 = arith.constant 6.250000e-02 : f32
    %19 = vector.broadcast %cst_6 : f32 to vector<16x1xf32>
    %20 = arith.mulf %11, %19 : vector<16x1xf32>
    %cst_7 = arith.constant 6.250000e-02 : f32
    %21 = vector.broadcast %cst_7 : f32 to vector<16x1xf32>
    %22 = arith.mulf %18, %21 : vector<16x1xf32>
    %23 = arith.mulf %20, %20 : vector<16x1xf32>
    %24 = arith.subf %22, %23 : vector<16x1xf32>
    %cst_8 = arith.constant 9.99999974E-6 : f32
    %25 = vector.broadcast %cst_8 : f32 to vector<16x1xf32>
    %26 = arith.addf %24, %25 : vector<16x1xf32>
    %27 = math.rsqrt %26 : vector<16x1xf32>
    %28 = vector.broadcast %20 : vector<16x1xf32> to vector<16x8xf32>
    %29 = arith.subf %3, %28 : vector<16x8xf32>
    %30 = vector.broadcast %27 : vector<16x1xf32> to vector<16x8xf32>
    %31 = arith.mulf %29, %30 : vector<16x8xf32>
    %32 = vector.broadcast %20 : vector<16x1xf32> to vector<16x8xf32>
    %33 = arith.subf %6, %32 : vector<16x8xf32>
    %34 = vector.broadcast %27 : vector<16x1xf32> to vector<16x8xf32>
    %35 = arith.mulf %33, %34 : vector<16x8xf32>
    %c0_9 = arith.constant 0 : index
    %c0_10 = arith.constant 0 : index
    %36 = vector.load %arg2[%c0_9, %c0_10] : memref<8x8xf32, #tpu.memory_space<vmem>>, vector<8x8xf32>
    %cst_11 = arith.constant dense<0.000000e+00> : vector<16x8xf32>
    %37 = tpu.matmul %31, %36, %cst_11 {dimension_numbers = #tpu.dot_dimension_numbers<[1], [0], [0], [1], [0, 0, 1, 1], [], []>} : vector<16x8xf32>, vector<8x8xf32>, vector<16x8xf32> -> vector<16x8xf32>
    %c0_12 = arith.constant 0 : index
    %c0_13 = arith.constant 0 : index
    %38 = vector.load %arg3[%c0_12, %c0_13] : memref<8x8xf32, #tpu.memory_space<vmem>>, vector<8x8xf32>
    %cst_14 = arith.constant dense<0.000000e+00> : vector<16x8xf32>
    %39 = tpu.matmul %35, %38, %cst_14 {dimension_numbers = #tpu.dot_dimension_numbers<[1], [0], [0], [1], [0, 0, 1, 1], [], []>} : vector<16x8xf32>, vector<8x8xf32>, vector<16x8xf32> -> vector<16x8xf32>
    %40 = arith.addf %37, %39 : vector<16x8xf32>
    %c0_15 = arith.constant 0 : index
    %c0_16 = arith.constant 0 : index
    %41 = vector.load %arg4[%c0_15, %c0_16] : memref<1x8xf32, #tpu.memory_space<vmem>>, vector<1x8xf32>
    %42 = vector.broadcast %41 : vector<1x8xf32> to vector<16x8xf32>
    %43 = arith.addf %40, %42 : vector<16x8xf32>
    %c0_17 = arith.constant 0 : index
    %c0_18 = arith.constant 0 : index
    %44 = vector.load %arg5[%c0_17, %c0_18] : memref<16x8xf32, #tpu.memory_space<vmem>>, vector<16x8xf32>
    tpu.vector_store %arg5[%c0_17, %c0_18], %43 {strides = array<i32>} : memref<16x8xf32, #tpu.memory_space<vmem>>, vector<16x8xf32>,
    return
  }
  func.func @transform_0(%arg0: i32) -> (i32, i32, i32, i32) {
    %c0_i32 = arith.constant 0 : i32
    %c0_i32_0 = arith.constant 0 : i32
    %c0_i32_1 = arith.constant 0 : i32
    %c0_i32_2 = arith.constant 0 : i32
    return %arg0, %c0_i32, %c0_i32_0, %c0_i32_1 : i32, i32, i32, i32
  }
  func.func @transform_1(%arg0: i32) -> (i32, i32) {
    %c0_i32 = arith.constant 0 : i32
    %c0_i32_0 = arith.constant 0 : i32
    %c0_i32_1 = arith.constant 0 : i32
    return %c0_i32, %c0_i32_0 : i32, i32
  }
  func.func @transform_2(%arg0: i32) -> (i32, i32) {
    %c0_i32 = arith.constant 0 : i32
    %c0_i32_0 = arith.constant 0 : i32
    %c0_i32_1 = arith.constant 0 : i32
    return %c0_i32, %c0_i32_0 : i32, i32
  }
  func.func @transform_3(%arg0: i32) -> (i32, i32) {
    %c0_i32 = arith.constant 0 : i32
    %c0_i32_0 = arith.constant 0 : i32
    %c0_i32_1 = arith.constant 0 : i32
    return %c0_i32, %c0_i32_0 : i32, i32
  }
  func.func @transform_4(%arg0: i32) -> (i32, i32) {
    %c0_i32 = arith.constant 0 : i32
    %c0_i32_0 = arith.constant 0 : i32
    return %arg0, %c0_i32 : i32, i32
  }
}

</mosaic_0001>

<bundles_post_ra>
// kernel: patch_merging.1
= control target key start
LH: loop header
LB: loop body
LE: loop exit
PB: predicated region body
PF: predicated region fallthrough
CT: control target
= control target key end

     0   :  { %9 = vsyncpa [#allocation3], 0  ;;  %s822_s0 = inlined_call_operand.vmem [shape: f32[16,2,8,8], index: 0, kind: input, shape index: {}]   ;;  %s823_s1 = inlined_call_operand.vmem [shape: f32[8,8], index: 1, kind: input, shape index: {}]   ;;  %s824_s2 = inlined_call_operand.vmem [shape: f32[8,8], index: 2, kind: input, shape index: {}]   ;;  %s825_s3 = inlined_call_operand.vmem [shape: f32[1,8], index: 3, kind: input, shape index: {}]   ;;  %s826_s4 = inlined_call_operand.hbm [shape: f32[128,8], index: 4, kind: output, shape index: {}]  }
   0x1   :  { %11 = vsyncpa [#allocation3 + $0x1], 0  ;;  %s685_s15 = smov 0   ;;  %s687_s16 = smov 0  }
   0x2   :  { %s689_s17 = smov 0   ;;  %s691_s18 = smov 0  }
   0x3 LB: > { %s706_s19 = sadd.s32 4294967295, %s655_s18   ;;  %s510_s20 = sadd.s32 4294967294, %s655_s18   ;;  %s655_s18 = sphi %s691_s18, %s832_s18   ;;  %s651_s17 = sphi %s689_s17, %s831_s17   ;;  %s647_s16 = sphi %s687_s16, %s830_s16   ;;  %s643_s15 = sphi %s685_s15, %s829_s15  }
   0x4   : > { %s710_s21 = sadd.s32 1, %s655_s18   ;;  %s113_s22 = sadd.s32 1, %s651_s17 }
   0x5   : > { %s110_s23 = ssub.s32 %s655_s18, %s710_s21  ;;  %p123_p0 = scmp.ne.s32.totalorder %s651_s17, %s647_s16 }
   0x6   : > { %p111_p1 = scmp.eq.s32.totalorder %s110_s23, 0  ;;  %p124_p2 = scmp.eq.s32.totalorder %s706_s19, 7 }
   0x7   : > { %p129_p3 = scmp.ne.s32.totalorder %s647_s16, %s643_s15  ;;  %p130_p4 = scmp.eq.s32.totalorder %s510_s20, 7 }
   0x8   : > { %s721_s24 = scalar_select %p111_p1, %s651_s17, %s113_s22  }
   0x9   : > { %p723_p5 = por %p124_p2, %p123_p0  ;;  %p727_p6 = por %p130_p4, %p129_p3 }
   0xa   : > { %p513_p7 = scmp.ge.s32.totalorder %s655_s18, 1  ;;  %p167_p8 = scmp.lt.s32.totalorder %s655_s18, 9 }
   0xc   : > { %p168_p9 = pnand %p513_p7, %p167_p8 }
   0xd   : > { %s515_s27 = sshll.u32 (!%p168_p9), %s706_s19, 1  ;;  %vm206_vm0 = vcmask (!%p168_p9), 64512   ;;  %v260_v16 = vld [vmem:[%s824_s2] sm:$0xff] (!%p168_p9)  ;;  %s191_s10 = sand.u32 (!%p168_p9), 1, %s647_s16  }
   0xe   : > { %171 = sbr.rel (%p168_p9) target bundleno = 433 (0x1b1), region = 36  ;;  %p195_p10 = scmp.lt.s32.totalorder (!%p168_p9), %s515_s27, 15  ;;  %v259_v17 = vld [vmem:[%s823_s1] sm:$0xff] (!%p168_p9)  ;;  %536 = vmatprep.subr.mxu1 (!%p168_p9), %v260_v16 }
   0xf   : > { %541 = vmatprep.subr.mxu0 (!%p168_p9), %v259_v17  ;;  %537 = vmatpush3.msra.mxu1 (!%p168_p9), %v260_v16  ;;  %s514_s11 = sshll.u32 (!%p168_p9), %s191_s10, 4  ;;  %v522_v52 = vld [vmem:[%s825_s3] ss:$0 sm:$0xff] (!%p168_p9)  ;;  %s529_s22 = sshll.u32 (!%p168_p9), %s706_s19, 8 }
  0x10   : > { %542 = vmatpush3.msra.mxu0 (!%p168_p9), %v259_v17  ;;  %s193_s14 = scalar_lea.vmem (!%p168_p9), [#allocation2], %s514_s11  ;;  %s781_s19 = scalar_lea.sflag (!%p168_p9), [#allocation3], %s191_s10 }
  0x11   : > { %s448_s20 = sshll.u32 (!%p168_p9), %s193_s14, 4  ;;  %s657_s30 = smov (!%p168_p9), [#allocation2]   ;;  %s777_s20 = int_to_ptr.vmem [resolvable:$true] %s448_s20 }
  0x12   : > { %s593_s29 = scalar_lea.vmem (!%p168_p9), %s777_s20, 256 }
  0x13   : > { %p594_p11 = scmp.ne.s32.totalorder (!%p168_p9), %s777_s20, %s593_s29 }
  0x15   : > { %s834_s27 = smov (!%p195_p10, %s515_s27), 15  ;;  %p595_p12 = pnand %p594_p11, %p723_p5 }
  0x16   : > { %s528_s28 = sshll.u32 %s834_s27, 4 }
  0x17   : > { %s199_s5 = scalar_lea.vmem %s822_s0, %s528_s28  ;;  %s775_s28 = scalar_lea.hbm %s826_s4, %s529_s22 }
  0x18   : > { %v737_v0 = vld [vmem:[%s199_s5 + $0x10] sm:$0xff]  ;;  %v202_v1 = vld [vmem:[%s199_s5] sm:$0xff]  ;;  %v739_v2 = vld [vmem:[%s199_s5 + $0x18] sm:$0xff]  ;;  %p596_p13 = pneg %p595_p12 }
  0x19   : > { %v210_v3 = vsel %vm206_vm0, %v737_v0, 0.0  ;;  %v207_v4 = vsel %vm206_vm0, %v202_v1, 0.0  ;;  %v203_v5 = vld [vmem:[%s199_s5 + $0x8] sm:$0xff]  ;;  %v216_v6 = vsel %vm206_vm0, %v739_v2, 0.0  ;;  %v221_v9 = vmul.f32 %v202_v1, %v202_v1  ;;  %s597_s5 = sshll.u32 %s657_s30, 4  ;;  %s598_s5 = int_to_ptr.vmem [resolvable:$false] %s597_s5 }
  0x1a   : > { %211 = vadd.xlane.f32.xlu1 %v210_v3  ;;  %208 = vadd.xlane.f32.xlu0 %v207_v4  ;;  %v213_v7 = vsel %vm206_vm0, %v203_v5, 0.0  ;;  %v229_v8 = vmul.f32 %v203_v5, %v203_v5  ;;  %v230_v12 = vmul.f32 %v739_v2, %v739_v2  ;;  %v222_v13 = vmul.f32 %v737_v0, %v737_v0  ;;  %s599_s6 = scalar_lea.vmem %s598_s5, 512  ;;  %p600_p0 = scmp.lt.s32.totalorder %s777_s20, %s598_s5 }
  0x1b   : > { %v223_v11 = vsel %vm206_vm0, %v221_v9, 0.0  ;;  %p601_p1 = scmp.lt.s32.totalorder %s599_s6, %s593_s29 }
  0x1c   : > { %v231_v10 = vsel %vm206_vm0, %v229_v8, 0.0  ;;  %v234_v14 = vsel %vm206_vm0, %v230_v12, 0.0  ;;  %v226_v15 = vsel %vm206_vm0, %v222_v13, 0.0 }
  0x1d   : > { %p602_p2 = por %p601_p1, %p600_p0 }
  0x1e   : > { %217 = vadd.xlane.f32.xlu1 %v216_v6  ;;  %214 = vadd.xlane.f32.xlu0 %v213_v7 }
  0x1f   : > { %p603_p3 = pnand %p602_p2, %p596_p13 }
  0x22   : > { %232 = vadd.xlane.f32.xlu1 %v231_v10  ;;  %224 = vadd.xlane.f32.xlu0 %v223_v11 }
  0x26   : > { %235 = vadd.xlane.f32.xlu1 %v234_v14  ;;  %227 = vadd.xlane.f32.xlu0 %v226_v15 }
  0xa7   : > { %v212_v18 = vpop.xlane.xlu1 %211  ;;  %v209_v19 = vpop.xlane.xlu0 %208 }
  0xab   : > { %v218_v20 = vpop.xlane.xlu1 %217  ;;  %v215_v21 = vpop.xlane.xlu0 %214 }
  0xac   : > { %v219_v22 = vadd.f32 %v215_v21, %v209_v19  ;;  %v220_v23 = vadd.f32 %v218_v20, %v212_v18 }
  0xae   : > { %v239_v24 = vmul.f32 0.0625, %v219_v22  ;;  %v240_v28 = vmul.f32 0.0625, %v220_v23 }
  0xaf   : > { %v233_v25 = vpop.xlane.xlu1 %232  ;;  %v225_v26 = vpop.xlane.xlu0 %224 }
  0xb0   : > { %v237_v27 = vadd.f32 %v233_v25, %v225_v26  ;;  %v243_v29 = vmul.f32 %v239_v24, %v239_v24  ;;  %v244_v36 = vmul.f32 %v240_v28, %v240_v28  ;;  %v255_v40 = vsub.f32 %v203_v5, %v239_v24 }
  0xb1   : > { %v251_v41 = vsub.f32 %v202_v1, %v239_v24  ;;  %v252_v45 = vsub.f32 %v737_v0, %v240_v28  ;;  %v256_v46 = vsub.f32 %v739_v2, %v240_v28 }
  0xb2   : > { %v241_v30 = vmul.f32 0.0625, %v237_v27 }
  0xb3   : > { %v236_v31 = vpop.xlane.xlu1 %235  ;;  %v228_v32 = vpop.xlane.xlu0 %227 }
  0xb4   : > { %v245_v33 = vsub.f32 %v241_v30, %v243_v29  ;;  %v238_v34 = vadd.f32 %v236_v31, %v228_v32 }
  0xb6   : > { %v247_v35 = vadd.f32 1e-05, %v245_v33  ;;  %v242_v37 = vmul.f32 0.0625, %v238_v34 }
  0xb8   : > { %589 = vrsqrt.f32 %v247_v35  ;;  %v246_v38 = vsub.f32 %v242_v37, %v244_v36 }
  0xba   : > { %v248_v39 = vadd.f32 1e-05, %v246_v38 }
  0xbc   : > { %591 = vrsqrt.f32 %v248_v39 }
  0xc2   : > { %v590_v42 = vpop.eup %589 }
  0xc3   : > { %v257_v43 = vmul.f32 %v590_v42, %v255_v40  ;;  %v253_v44 = vmul.f32 %v590_v42, %v251_v41 }
  0xc5   : > { %538 = vmatprep.mubr.msk.f32.mxu1 %vm206_vm0, %v257_v43  ;;  %543 = vmatprep.mubr.msk.f32.mxu0 %vm206_vm0, %v253_v44 }
  0xc6   : > { %v592_v47 = vpop.eup %591 }
  0xc7   : > { %v258_v48 = vmul.f32 %v592_v47, %v256_v46  ;;  %v254_v49 = vmul.f32 %v592_v47, %v252_v45 }
  0xc9   : > { %539 = vmatmul.mubr.msk.f32.vlgmr.msra.gmra.mrb[0].mxu1 %vm206_vm0, %v258_v48  ;;  %544 = vmatmul.mubr.msk.f32.vlgmr.msra.gmra.mrb[0].mxu0 %vm206_vm0, %v254_v49 }
 0x19c   : > { %v540_v50 = vpop.f32.mrb[0].mxu1  ;;  %v545_v51 = vpop.f32.mrb[0].mxu0 }
 0x19d   : > { %v420_v53 = vadd.f32 %v545_v51, %v540_v50  ;;  %v333_v54 = vpop.f32.mrb[1].mxu1  ;;  %v414_v55 = vpop.f32.mrb[1].mxu0 }
 0x19e   : > { %v415_v56 = vadd.f32 %v414_v55, %v333_v54 }
 0x19f   : > { %v431_v57 = vadd.f32 %v522_v52, %v420_v53 }
 0x1a0   : > { %v430_v58 = vadd.f32 %v522_v52, %v415_v56 }
 0x1a1   : > { %433 = vst.msk [vmem:[%s193_s14 + $0x8] sm:$0xff] %vm206_vm0, %v431_v57 }
 0x1a2   : > { %432 = vst.msk [vmem:[%s193_s14] sm:$0xff] %vm206_vm0, %v430_v58 }
 0x1a3   : > { %606 = shalt.err (!%p603_p3)
}
 0x1a4   : > { %s607_s7 = scalar_lea.hbm %s775_s28, 256  ;;  %s611_s10 = scalar_lea.hbm %s826_s4, 2048 }
 0x1a5   : > { %p608_p4 = scmp.ne.s32.totalorder %s775_s28, %s607_s7  ;;  %p612_p9 = scmp.lt.u32.totalorder %s775_s28, %s826_s4 }
 0x1a6   : > { %p613_p10 = scmp.lt.u32.totalorder %s611_s10, %s607_s7  ;;  %p615_p12 = scmp.lt.u32.totalorder %s607_s7, %s775_s28 }
 0x1a7   : > { %p609_p7 = pnand %p608_p4, %p723_p5 }
 0x1a8   : > { %p614_p11 = por %p613_p10, %p612_p9 }
 0x1a9   : > { %p610_p8 = pneg %p609_p7 }
 0x1aa   : > { %p616_p13 = por %p615_p12, %p614_p11 }
 0x1ac   : > { %p617_p0 = pnand %p616_p13, %p610_p8 }
 0x1ae   : > { %620 = shalt.err (!%p617_p0)
}
 0x1af   : > { %s658_s13 = smov 128   ;;  %s659_s14 = smov 8  }
 0x1b0   : > { %548 = dma.vmem_to_hbm [thread:$0]  (%p723_p5), %s777_s20, 256, %s775_s28, %s781_s19, %s658_s13, %s658_s13, %s659_s14  }
 0x1b1 PF: > { %p554_p1 = scmp.ge.s32.totalorder %s655_s18, 2  ;;  %s463_s22 = sand.u32 1, %s643_s15  }
 0x1b2   : > { %s464_s23 = scalar_lea.sflag [#allocation3], %s463_s22 }
 0x1b3   : > { %p551_p2 = pnand %p554_p1, %p727_p6 }
 0x1b5   : > { %638 = dma.done.wait (!%p551_p2), %s464_s23, 256  }
 0x1b6   : > { %640 = vsyncadd (!%p551_p2), %s464_s23, 4294967040  ;;  %p14_p3 = scmp.ge.s32.totalorder %s710_s21, 10   ;;  %s829_s15 = smov %s647_s16 }
 0x1b7   : > { %s830_s16 = smov %s651_s17  ;;  %s831_s17 = smov %s721_s24 }
 0x1b8   : > { %s832_s18 = smov %s710_s21  ;;  %16 = sbr.rel (!%p14_p3) target bundleno = 3 (0x3), region = 71 }
 0x1bf   :  { %469 = vsyncpa [#allocation3], 1 }
 0x1c0   :  { %471 = vsyncpa [#allocation3 + $0x1], 1 }

</bundles_post_ra>
